<compile_context>
chip_gen: v5e
topology: v5e:2x2
jax: 0.10.0
libtpu: 0.0.40
codegen_flags: <defaults>
</compile_context>

<pallas_src>
import math

import jax
import jax.numpy as jnp
from jax.experimental import pallas as pl
from jax.experimental.pallas import tpu as pltpu

BN_EPS = 1e-5


def gating_context_kernel(x_ref, w_ref, gamma_ref, beta_ref, o_ref):
    j = pl.program_id(0)
    _, t = o_ref.shape
    col0 = j * t
    if t % 128 == 0:                      # static: hint lane alignment for the dynamic slices
        col0 = pl.multiple_of(col0, 128)

    # MXU: (N, D) bf16 @ (D, T) bf16 -> (N, T) f32 accumulate.
    gates = jnp.dot(x_ref[...], w_ref[...], preferred_element_type=jnp.float32)

    # BatchNorm1d training-mode stats (per feature, biased variance over the batch).
    # Two-pass centered form avoids E[x^2] - mean^2 cancellation; the affine folds to
    # centered * scale + beta.
    mean = jnp.mean(gates, axis=0, keepdims=True)                  # (1, T)
    centered = gates - mean                                        # (N, T)
    var = jnp.mean(centered * centered, axis=0, keepdims=True)     # (1, T), biased
    inv_std = jax.lax.rsqrt(var + BN_EPS)                          # EUP
    scale = inv_std * gamma_ref[:, pl.ds(col0, t)]                 # (1, T)
    g = jax.nn.sigmoid(centered * scale + beta_ref[:, pl.ds(col0, t)])   # (N, T), EUP sigmoid

    # Gating multiply against the resident bf16 x columns (upcast to f32).
    x_cols = x_ref[:, pl.ds(col0, t)].astype(jnp.float32)
    o_ref[...] = (x_cols * g).astype(o_ref.dtype)


def _vmem_capacity_bytes():
    """Physical VMEM per TensorCore; conservative fallback if the query is unavailable."""
    try:
        info = pltpu.get_tpu_info()
        for attr in ("vmem_capacity_bytes", "vmem_size_bytes", "vmem_bytes"):
            v = getattr(info, attr, None)
            if v:
                return int(v)
    except Exception:
        pass
    return 64 << 20  # v7x per-TC VMEM (smallest across v5e/v6e/v7x)


def _block_spec(shape, index_map, buffers=None):
    """BlockSpec with an optional multi-buffering hint; degrades to defaults if the
    pipeline_mode API is unavailable in this JAX version."""
    if buffers is not None and hasattr(pl, "Buffered"):
        try:
            return pl.BlockSpec(shape, index_map, pipeline_mode=pl.Buffered(buffers))
        except TypeError:
            pass
    return pl.BlockSpec(shape, index_map)


def gating_context(x, gating_weights, gamma, beta, *, tile_d=None):
    """x: (N, D) f32; gating_weights: (D, D); gamma/beta: (1, D) BN affine params."""
    N, D = x.shape
    assert gating_weights.shape == (D, D)
    assert gamma.shape == (1, D) and beta.shape == (1, D)

    vmem_budget = int(_vmem_capacity_bytes() * 0.75)

    def footprint(t, w_bufs):
        return (N * D * 2               # resident bf16 x (single-buffered)
                + w_bufs * D * t * 2    # W column-slab buffers (bf16)
                + 2 * 2 * D * 4         # gamma + beta resident (2 bufs each, tiny)
                + 2 * N * t * 4)        # output slab (f32, double-buffered)

    # --- Feature-tile selection -------------------------------------------------------
    if tile_d is None:
        if D <= 512 or D % 128 != 0:
            tile_d = D                  # tiny / awkward D: single full-width block, grid=(1,)
        else:
            tile_d = 128
            for cand in (512, 256, 128):
                if D % cand == 0 and footprint(cand, 2) <= vmem_budget:
                    tile_d = cand
                    break
    assert D % tile_d == 0, "tile_d must divide D"
    num_tiles = D // tile_d
    if num_tiles > 1:
        assert tile_d % 128 == 0, "tiled path requires a lane-dense (multiple-of-128) tile_d"

    # --- Pipeline depths ----------------------------------------------------------------
    # x: constant block index -> fetched once; single buffer is enough.
    x_bufs = 1
    # W: deepen to 3 buffers for small N (matmul can't cover the W slab DMA), if it fits.
    w_bufs = 3 if (num_tiles >= 3 and N <= 512) else 2
    while w_bufs > 2 and footprint(tile_d, w_bufs) > vmem_budget:
        w_bufs -= 1
    w_bufs_spec = w_bufs if num_tiles > 1 else None

    vmem_est = footprint(tile_d, w_bufs)
    vmem_limit = int(min(vmem_budget, max(32 << 20, int(vmem_est * 1.25) + (2 << 20))))
    if vmem_est > vmem_limit:
        # TODO(synk): N-tiled BN-stat accumulation fallback for resident-x overflow.
        raise ValueError(
            f"GatingContext working set ({vmem_est / 2**20:.1f} MiB) exceeds the VMEM budget "
            f"({vmem_budget / 2**20:.1f} MiB); an N-tiled restructuring is required.")

    # Cast MXU operands to bf16 once (f32 accumulation inside the kernel).
    x_mxu = x.astype(jnp.bfloat16)
    w_mxu = gating_weights.astype(jnp.bfloat16)

    cost = pl.CostEstimate(
        flops=2 * N * D * D + 10 * N * D,
        transcendentals=N * D + D,
        bytes_accessed=N * D * 2 + D * D * 2 + 2 * D * 4 + N * D * 4,
    )

    grid_spec = pltpu.PrefetchScalarGridSpec(
        num_scalar_prefetch=0,
        grid=(num_tiles,),
        in_specs=[
            _block_spec((N, D), lambda j: (0, 0), buffers=x_bufs),       # resident bf16 x (LHS + gating)
            _block_spec((D, tile_d), lambda j: (0, j), buffers=w_bufs_spec),  # W column slab
            _block_spec((1, D), lambda j: (0, 0)),                       # gamma, resident
            _block_spec((1, D), lambda j: (0, 0)),                       # beta, resident
        ],
        out_specs=pl.BlockSpec((N, tile_d), lambda j: (0, j)),
    )

    return pl.pallas_call(
        gating_context_kernel,
        out_shape=jax.ShapeDtypeStruct((N, D), x.dtype),
        grid_spec=grid_spec,
        compiler_params=pltpu.CompilerParams(
            dimension_semantics=("parallel",),
            vmem_limit_bytes=vmem_limit,
        ),
        cost_estimate=cost,
    )(x_mxu, w_mxu, gamma, beta)


def reference(x, w, gamma, beta):
    # Matches the kernel's MXU numerics (bf16 operands, f32 accumulation); x stays f32 in
    # the gating multiply, which is the main remaining numeric difference vs the kernel
    # (kernel gates with the resident bf16 x) — covered by the rtol below.
    gates = jnp.dot(x.astype(jnp.bfloat16), w.astype(jnp.bfloat16),
                    preferred_element_type=jnp.float32)
    mean = gates.mean(axis=0, keepdims=True)
    centered = gates - mean
    var = (centered * centered).mean(axis=0, keepdims=True)
    gates = centered * jax.lax.rsqrt(var + BN_EPS) * gamma + beta
    return x * jax.nn.sigmoid(gates)


if __name__ == "__main__":
    # Small shapes: batch N=32 descriptors, feature dim D=256.
    N, D = 32, 256
    key = jax.random.PRNGKey(0)
    kx, kw = jax.random.split(key)

    x = jax.random.normal(kx, (N, D), dtype=jnp.float32)
    # nn.Parameter(torch.randn(dim, dim) * 1/sqrt(dim)) -> deterministic synthetic init.
    gating_weights = jax.random.normal(kw, (D, D), dtype=jnp.float32) / math.sqrt(D)
    # BatchNorm1d default affine init: weight=1, bias=0.
    gamma = jnp.ones((1, D), dtype=jnp.float32)
    beta = jnp.zeros((1, D), dtype=jnp.float32)

    ref = reference(x, gating_weights, gamma, beta)

    # Default config: D <= 512 -> single full-width block, grid=(1,) (no tiling overhead).
    out = jax.block_until_ready(gating_context(x, gating_weights, gamma, beta))
    assert jnp.allclose(out, ref, atol=2e-3, rtol=1e-2), "mismatch (single-block path)"

    # Tiled path (exercises the pl.ds slicing of the resident LHS): tile_d=128, grid=(2,).
    out_tiled = jax.block_until_ready(
        gating_context(x, gating_weights, gamma, beta, tile_d=128))
    assert jnp.allclose(out_tiled, ref, atol=2e-3, rtol=1e-2), "mismatch (tiled path)"

    print("KERNEL_OK")
</pallas_src>

<mosaic_0001>
module attributes {stable_mosaic.version = 11 : i64} {
  func.func @gating_context_kernel(%arg0: i32, %arg1: memref<32x256xbf16, #tpu.memory_space<vmem>>, %arg2: memref<256x256xbf16, #tpu.memory_space<vmem>>, %arg3: memref<1x256xf32, #tpu.memory_space<vmem>>, %arg4: memref<1x256xf32, #tpu.memory_space<vmem>>, %arg5: memref<32x256xf32, #tpu.memory_space<vmem>>) attributes {dimension_semantics = [#tpu.dimension_semantics<parallel>], iteration_bounds = array<i64: 1>, scalar_prefetch = 0 : i64, scratch_operands = 0 : i64, tpu.core_type = #tpu.core_type<tc>, window_params = [{pipeline_mode = #tpu.pipeline_mode<synchronous>, transform_indices = @transform_0, window_bounds = array<i64: 32, 256>}, {transform_indices = @transform_1, window_bounds = array<i64: 256, 256>}, {pipeline_mode = #tpu.pipeline_mode<synchronous>, transform_indices = @transform_2, window_bounds = array<i64: 1, 256>}, {pipeline_mode = #tpu.pipeline_mode<synchronous>, transform_indices = @transform_3, window_bounds = array<i64: 1, 256>}, {transform_indices = @transform_4, window_bounds = array<i64: 32, 256>}]} {
    %c256_i32 = arith.constant 256 : i32
    %0 = arith.muli %arg0, %c256_i32 : i32
    %1 = tpu.assume_multiple %0, 128 : i32
    %c0 = arith.constant 0 : index
    %c0_0 = arith.constant 0 : index
    %2 = vector.load %arg1[%c0, %c0_0] : memref<32x256xbf16, #tpu.memory_space<vmem>>, vector<32x256xbf16>
    %c0_1 = arith.constant 0 : index
    %c0_2 = arith.constant 0 : index
    %3 = vector.load %arg2[%c0_1, %c0_2] : memref<256x256xbf16, #tpu.memory_space<vmem>>, vector<256x256xbf16>
    %cst = arith.constant dense<0.000000e+00> : vector<32x256xf32>
    %4 = tpu.matmul %2, %3, %cst {dimension_numbers = #tpu.dot_dimension_numbers<[1], [0], [0], [1], [0, 0, 1, 1], [], []>} : vector<32x256xbf16>, vector<256x256xbf16>, vector<32x256xf32> -> vector<32x256xf32>
    %cst_3 = arith.constant dense<0.000000e+00> : vector<256xf32>
    %5 = vector.multi_reduction <add>, %4, %cst_3 [0] : vector<32x256xf32> to vector<256xf32>
    %6 = vector.shape_cast %5 : vector<256xf32> to vector<1x256xf32>
    %cst_4 = arith.constant 3.200000e+01 : f32
    %7 = vector.broadcast %cst_4 : f32 to vector<1x256xf32>
    %8 = arith.divf %6, %7 : vector<1x256xf32>
    %9 = vector.broadcast %8 : vector<1x256xf32> to vector<32x256xf32>
    %10 = arith.subf %4, %9 : vector<32x256xf32>
    %11 = arith.mulf %10, %10 : vector<32x256xf32>
    %cst_5 = arith.constant dense<0.000000e+00> : vector<256xf32>
    %12 = vector.multi_reduction <add>, %11, %cst_5 [0] : vector<32x256xf32> to vector<256xf32>
    %13 = vector.shape_cast %12 : vector<256xf32> to vector<1x256xf32>
    %cst_6 = arith.constant 3.200000e+01 : f32
    %14 = vector.broadcast %cst_6 : f32 to vector<1x256xf32>
    %15 = arith.divf %13, %14 : vector<1x256xf32>
    %cst_7 = arith.constant 9.99999974E-6 : f32
    %16 = vector.broadcast %cst_7 : f32 to vector<1x256xf32>
    %17 = arith.addf %15, %16 : vector<1x256xf32>
    %18 = math.rsqrt %17 : vector<1x256xf32>
    %c0_8 = arith.constant 0 : index
    %19 = arith.index_cast %1 : i32 to index
    %20 = vector.load %arg3[%c0_8, %19] : memref<1x256xf32, #tpu.memory_space<vmem>>, vector<1x256xf32>
    %21 = arith.mulf %18, %20 : vector<1x256xf32>
    %22 = vector.broadcast %21 : vector<1x256xf32> to vector<32x256xf32>
    %23 = arith.mulf %10, %22 : vector<32x256xf32>
    %c0_9 = arith.constant 0 : index
    %24 = arith.index_cast %1 : i32 to index
    %25 = vector.load %arg4[%c0_9, %24] : memref<1x256xf32, #tpu.memory_space<vmem>>, vector<1x256xf32>
    %26 = vector.broadcast %25 : vector<1x256xf32> to vector<32x256xf32>
    %27 = arith.addf %23, %26 : vector<32x256xf32>
    %28 = arith.negf %27 : vector<32x256xf32>
    %29 = math.exp %28 : vector<32x256xf32>
    %cst_10 = arith.constant 1.000000e+00 : f32
    %30 = vector.broadcast %cst_10 : f32 to vector<32x256xf32>
    %31 = arith.addf %30, %29 : vector<32x256xf32>
    %32 = arith.divf %30, %31 : vector<32x256xf32>
    %c0_11 = arith.constant 0 : index
    %33 = arith.index_cast %1 : i32 to index
    %34 = vector.load %arg1[%c0_11, %33] : memref<32x256xbf16, #tpu.memory_space<vmem>>, vector<32x256xbf16>
    %35 = arith.extf %34 : vector<32x256xbf16> to vector<32x256xf32>
    %36 = arith.mulf %35, %32 : vector<32x256xf32>
    %c0_12 = arith.constant 0 : index
    %c0_13 = arith.constant 0 : index
    %37 = vector.load %arg5[%c0_12, %c0_13] : memref<32x256xf32, #tpu.memory_space<vmem>>, vector<32x256xf32>
    tpu.vector_store %arg5[%c0_12, %c0_13], %36 {strides = array<i32>} : memref<32x256xf32, #tpu.memory_space<vmem>>, vector<32x256xf32>,
    return
  }
  func.func @transform_0(%arg0: i32) -> (i32, i32) {
    %c0_i32 = arith.constant 0 : i32
    %c0_i32_0 = arith.constant 0 : i32
    %c0_i32_1 = arith.constant 0 : i32
    return %c0_i32, %c0_i32_0 : i32, i32
  }
  func.func @transform_1(%arg0: i32) -> (i32, i32) {
    %c0_i32 = arith.constant 0 : i32
    %c0_i32_0 = arith.constant 0 : i32
    return %c0_i32, %arg0 : i32, i32
  }
  func.func @transform_2(%arg0: i32) -> (i32, i32) {
    %c0_i32 = arith.constant 0 : i32
    %c0_i32_0 = arith.constant 0 : i32
    %c0_i32_1 = arith.constant 0 : i32
    return %c0_i32, %c0_i32_0 : i32, i32
  }
  func.func @transform_3(%arg0: i32) -> (i32, i32) {
    %c0_i32 = arith.constant 0 : i32
    %c0_i32_0 = arith.constant 0 : i32
    %c0_i32_1 = arith.constant 0 : i32
    return %c0_i32, %c0_i32_0 : i32, i32
  }
  func.func @transform_4(%arg0: i32) -> (i32, i32) {
    %c0_i32 = arith.constant 0 : i32
    %c0_i32_0 = arith.constant 0 : i32
    return %c0_i32, %arg0 : i32, i32
  }
}

</mosaic_0001>

<bundles_post_ra>
// kernel: tpu_custom_call.1
= control target key start
LH: loop header
LB: loop body
LE: loop exit
PB: predicated region body
PF: predicated region fallthrough
CT: control target
= control target key end

     0   :  { %9 = vsyncpa [#allocation3], 0  ;;  %s1229_s0 = inlined_call_operand.hbm [shape: bf16[32,256], index: 0, kind: input, shape index: {}]   ;;  %s1230_s1 = inlined_call_operand.hbm [shape: bf16[256,256], index: 1, kind: input, shape index: {}]   ;;  %s1231_s2 = inlined_call_operand.hbm [shape: f32[1,256], index: 2, kind: input, shape index: {}]   ;;  %s1232_s3 = inlined_call_operand.vmem [shape: f32[1,256], index: 3, kind: input, shape index: {}]   ;;  %s1233_s4 = inlined_call_operand.hbm [shape: f32[32,256], index: 4, kind: output, shape index: {}]  }
   0x1   :  { %10 = vsyncpa [#allocation6], 0 }
   0x2   :  { %11 = vsyncpa [#allocation4], 0  ;;  %s29_s17 = sshll.u32 %s1230_s1, 4  ;;  %s1020_s18 = smov [#allocation5]   ;;  %s30_s17 = int_to_ptr.hbm [resolvable:$true] %s29_s17 }
   0x3   :  { %s31_s19 = sshll.u32 %s1020_s18, 4  ;;  %s16_s22 = sshll.u32 %s1229_s0, 4  ;;  %s32_s19 = int_to_ptr.vmem [resolvable:$true] %s31_s19  ;;  %s17_s22 = int_to_ptr.hbm [resolvable:$true] %s16_s22 }
   0x4   :  { %s1021_s23 = smov 128   ;;  %s1022_s24 = smov 8  }
   0x5   :  { %37 = dma.hbm_to_vmem [thread:$0]  %s30_s17, 4096, %s32_s19, [#allocation6], %s1021_s23, %s1021_s23, %s1022_s24  }
   0x6   :  { %s1023_s25 = smov [#allocation2]   ;;  %s43_s29 = sshll.u32 %s1231_s2, 4  ;;  %s44_s29 = int_to_ptr.hbm [resolvable:$true] %s43_s29 }
   0x7   :  { %s18_s26 = sshll.u32 %s1023_s25, 4  ;;  %s1024_s1 = smov [#allocation7]   ;;  %s19_s26 = int_to_ptr.vmem [resolvable:$true] %s18_s26 }
   0x8   :  { %24 = dma.hbm_to_vmem [thread:$0]  %s17_s22, 512, %s19_s26, [#allocation3], %s1021_s23, %s1021_s23, %s1022_s24  }
   0x9   :  { %s45_s30 = sshll.u32 %s1024_s1, 4  ;;  %s46_s30 = int_to_ptr.vmem [resolvable:$true] %s45_s30 }
   0xa   :  { %48 = dma.hbm_to_vmem [thread:$0]  %s44_s29, 32, %s46_s30, [#allocation6]  }
   0xb   :  { %1014 = dma.done.wait [#allocation3], 512  }
   0xc   :  { %1015 = vsyncadd [#allocation3], 4294966784 }
   0xd   :  { %1016 = dma.done.wait [#allocation6], 4128  }
   0xe   :  { %1017 = vsyncadd [#allocation6], 4294963168  ;;  %v757_v0 = vld [vmem:[#allocation5 + $0x70] sm:$0xf]  ;;  %v854_v1 = vld [vmem:[#allocation5 + $0x74] sm:$0xf0] }
   0xf   :  { %v821_v2 = vld [vmem:[#allocation5 + $0xf0] sm:$0xf]  ;;  %v758_v3 = vor.u32 %v854_v1, %v757_v0  ;;  %v870_v4 = vld [vmem:[#allocation5 + $0xf4] sm:$0xf0]  ;;  %v853_v5 = vld [vmem:[#allocation5 + $0x74] sm:$0xf] }
  0x10   :  { %v759_v6 = vld [vmem:[#allocation5 + $0x78] sm:$0xf0]  ;;  %v822_v7 = vor.u32 %v870_v4, %v821_v2  ;;  %v869_v9 = vld [vmem:[#allocation5 + $0xf4] sm:$0xf]  ;;  %v749_v11 = vld [vmem:[#allocation5 + $0x60] sm:$0xf] }
  0x11   :  { %v762_v8 = vor.u32 %v853_v5, %v759_v6  ;;  %v823_v10 = vld [vmem:[#allocation5 + $0xf8] sm:$0xf0]  ;;  %280 = vmatpush.bf16.msra.mxu0 %v758_v3  ;;  %v852_v13 = vld [vmem:[#allocation5 + $0x64] sm:$0xf0]  ;;  %v813_v14 = vld [vmem:[#allocation5 + $0xe0] sm:$0xf] }
  0x12   :  { %v826_v12 = vor.u32 %v869_v9, %v823_v10  ;;  %v868_v15 = vld [vmem:[#allocation5 + $0xe4] sm:$0xf0]  ;;  %299 = vmatpush.bf16.msra.mxu1 %v822_v7  ;;  %v750_v16 = vor.u32 %v852_v13, %v749_v11  ;;  %v851_v18 = vld [vmem:[#allocation5 + $0x64] sm:$0xf]  ;;  %v751_v19 = vld [vmem:[#allocation5 + $0x68] sm:$0xf0] }
  0x13   :  { %318 = vmatpush.bf16.msra.mxu2 %v762_v8  ;;  %v814_v17 = vor.u32 %v868_v15, %v813_v14  ;;  %v867_v20 = vld [vmem:[#allocation5 + $0xe4] sm:$0xf]  ;;  %v754_v21 = vor.u32 %v851_v18, %v751_v19  ;;  %v815_v22 = vld [vmem:[#allocation5 + $0xe8] sm:$0xf0]  ;;  %v741_v23 = vld [vmem:[#allocation5 + $0x50] sm:$0xf] }
  0x14   :  { %337 = vmatpush.bf16.msra.mxu3 %v826_v12  ;;  %v850_v24 = vld [vmem:[#allocation5 + $0x54] sm:$0xf0]  ;;  %v818_v25 = vor.u32 %v867_v20, %v815_v22  ;;  %v805_v26 = vld [vmem:[#allocation5 + $0xd0] sm:$0xf]  ;;  %v849_v28 = vld [vmem:[#allocation5 + $0x54] sm:$0xf] }
  0x15   :  { %v866_v27 = vld [vmem:[#allocation5 + $0xd4] sm:$0xf0]  ;;  %281 = vmatpush.bf16.msra.mxu0 %v750_v16  ;;  %v742_v29 = vor.u32 %v850_v24, %v741_v23  ;;  %v743_v30 = vld [vmem:[#allocation5 + $0x58] sm:$0xf0]  ;;  %v865_v31 = vld [vmem:[#allocation5 + $0xd4] sm:$0xf] }
  0x16   :  { %v807_v32 = vld [vmem:[#allocation5 + $0xd8] sm:$0xf0]  ;;  %300 = vmatpush.bf16.msra.mxu1 %v814_v17  ;;  %v806_v33 = vor.u32 %v866_v27, %v805_v26  ;;  %v746_v34 = vor.u32 %v849_v28, %v743_v30  ;;  %v733_v35 = vld [vmem:[#allocation5 + $0x40] sm:$0xf]  ;;  %v848_v36 = vld [vmem:[#allocation5 + $0x44] sm:$0xf0] }
  0x17   :  { %319 = vmatpush.bf16.msra.mxu2 %v754_v21  ;;  %v797_v37 = vld [vmem:[#allocation5 + $0xc0] sm:$0xf]  ;;  %v810_v38 = vor.u32 %v865_v31, %v807_v32  ;;  %v864_v39 = vld [vmem:[#allocation5 + $0xc4] sm:$0xf0]  ;;  %v847_v40 = vld [vmem:[#allocation5 + $0x44] sm:$0xf]  ;;  %v734_v44 = vor.u32 %v848_v36, %v733_v35 }
  0x18   :  { %338 = vmatpush.bf16.msra.mxu3 %v818_v25  ;;  %v735_v41 = vld [vmem:[#allocation5 + $0x48] sm:$0xf0]  ;;  %v863_v42 = vld [vmem:[#allocation5 + $0xc4] sm:$0xf]  ;;  %v798_v45 = vor.u32 %v864_v39, %v797_v37  ;;  %v725_v47 = vld [vmem:[#allocation5 + $0x30] sm:$0xf] }
  0x19   :  { %v799_v43 = vld [vmem:[#allocation5 + $0xc8] sm:$0xf0]  ;;  %282 = vmatpush.bf16.msra.mxu0 %v742_v29  ;;  %v738_v46 = vor.u32 %v847_v40, %v735_v41  ;;  %v846_v48 = vld [vmem:[#allocation5 + $0x34] sm:$0xf0]  ;;  %v789_v49 = vld [vmem:[#allocation5 + $0xb0] sm:$0xf] }
  0x1a   :  { %301 = vmatpush.bf16.msra.mxu1 %v806_v33  ;;  %v802_v50 = vor.u32 %v863_v42, %v799_v43  ;;  %v862_v51 = vld [vmem:[#allocation5 + $0xb4] sm:$0xf0]  ;;  %v845_v52 = vld [vmem:[#allocation5 + $0x34] sm:$0xf]  ;;  %v727_v53 = vld [vmem:[#allocation5 + $0x38] sm:$0xf0]  ;;  %v726_v56 = vor.u32 %v846_v48, %v725_v47 }
  0x1b   :  { %320 = vmatpush.bf16.msra.mxu2 %v746_v34  ;;  %v861_v54 = vld [vmem:[#allocation5 + $0xb4] sm:$0xf]  ;;  %v791_v55 = vld [vmem:[#allocation5 + $0xb8] sm:$0xf0]  ;;  %v790_v57 = vor.u32 %v862_v51, %v789_v49  ;;  %v730_v58 = vor.u32 %v845_v52, %v727_v53  ;;  %v717_v59 = vld [vmem:[#allocation5 + $0x20] sm:$0xf] }
  0x1c   :  { %339 = vmatpush.bf16.msra.mxu3 %v810_v38  ;;  %v844_v60 = vld [vmem:[#allocation5 + $0x24] sm:$0xf0]  ;;  %v781_v61 = vld [vmem:[#allocation5 + $0xa0] sm:$0xf]  ;;  %v794_v62 = vor.u32 %v861_v54, %v791_v55  ;;  %v843_v0 = vld [vmem:[#allocation5 + $0x24] sm:$0xf] }
  0x1d   :  { %283 = vmatpush.bf16.msra.mxu0 %v734_v44  ;;  %v860_v63 = vld [vmem:[#allocation5 + $0xa4] sm:$0xf0]  ;;  %v719_v1 = vld [vmem:[#allocation5 + $0x28] sm:$0xf0]  ;;  %v859_v2 = vld [vmem:[#allocation5 + $0xa4] sm:$0xf]  ;;  %v718_v4 = vor.u32 %v844_v60, %v717_v59 }
  0x1e   :  { %302 = vmatpush.bf16.msra.mxu1 %v798_v45  ;;  %v783_v3 = vld [vmem:[#allocation5 + $0xa8] sm:$0xf0]  ;;  %v782_v5 = vor.u32 %v860_v63, %v781_v61  ;;  %v722_v6 = vor.u32 %v843_v0, %v719_v1  ;;  %v709_v7 = vld [vmem:[#allocation5 + $0x10] sm:$0xf]  ;;  %v842_v8 = vld [vmem:[#allocation5 + $0x14] sm:$0xf0] }
  0x1f   :  { %321 = vmatpush.bf16.msra.mxu2 %v738_v46  ;;  %v773_v9 = vld [vmem:[#allocation5 + $0x90] sm:$0xf]  ;;  %v786_v10 = vor.u32 %v859_v2, %v783_v3  ;;  %v858_v11 = vld [vmem:[#allocation5 + $0x94] sm:$0xf0]  ;;  %v841_v12 = vld [vmem:[#allocation5 + $0x14] sm:$0xf]  ;;  %v710_v16 = vor.u32 %v842_v8, %v709_v7 }
  0x20   :  { %340 = vmatpush.bf16.msra.mxu3 %v802_v50  ;;  %v711_v13 = vld [vmem:[#allocation5 + $0x18] sm:$0xf0]  ;;  %v857_v14 = vld [vmem:[#allocation5 + $0x94] sm:$0xf]  ;;  %v774_v17 = vor.u32 %v858_v11, %v773_v9  ;;  %v701_v19 = vld [vmem:[#allocation5] sm:$0xf] }
  0x21   :  { %284 = vmatpush.bf16.msra.mxu0 %v726_v56  ;;  %v775_v15 = vld [vmem:[#allocation5 + $0x98] sm:$0xf0]  ;;  %v714_v18 = vor.u32 %v841_v12, %v711_v13  ;;  %v840_v20 = vld [vmem:[#allocation5 + $0x4] sm:$0xf0]  ;;  %v765_v21 = vld [vmem:[#allocation5 + $0x80] sm:$0xf] }
  0x22   :  { %303 = vmatpush.bf16.msra.mxu1 %v790_v57  ;;  %v778_v22 = vor.u32 %v857_v14, %v775_v15  ;;  %v856_v23 = vld [vmem:[#allocation5 + $0x84] sm:$0xf0]  ;;  %v839_v24 = vld [vmem:[#allocation5 + $0x4] sm:$0xf]  ;;  %v703_v25 = vld [vmem:[#allocation5 + $0x8] sm:$0xf0]  ;;  %v702_v28 = vor.u32 %v840_v20, %v701_v19 }
  0x23   :  { %322 = vmatpush.bf16.msra.mxu2 %v730_v58  ;;  %v855_v26 = vld [vmem:[#allocation5 + $0x84] sm:$0xf]  ;;  %v767_v27 = vld [vmem:[#allocation5 + $0x88] sm:$0xf0]  ;;  %v685_v29 = vld [vmem:[#allocation2] sm:$0xf]  ;;  %v766_v31 = vor.u32 %v856_v23, %v765_v21  ;;  %v706_v32 = vor.u32 %v839_v24, %v703_v25 }
  0x24   :  { %341 = vmatpush.bf16.msra.mxu3 %v794_v62  ;;  %v836_v30 = vld [vmem:[#allocation2 + $0x4] sm:$0xf0]  ;;  %v835_v33 = vld [vmem:[#allocation2 + $0x4] sm:$0xf]  ;;  %v687_v34 = vld [vmem:[#allocation2 + $0x8] sm:$0xf0]  ;;  %v770_v35 = vor.u32 %v855_v26, %v767_v27 }
  0x25   :  { %285 = vmatpush.bf16.msra.mxu0 %v718_v4  ;;  %v686_v36 = vor.u32 %v836_v30, %v685_v29  ;;  %v690_v37 = vor.u32 %v835_v33, %v687_v34  ;;  %v693_v38 = vld [vmem:[#allocation2 + $0x10] sm:$0xf]  ;;  %v838_v39 = vld [vmem:[#allocation2 + $0x14] sm:$0xf0]  ;;  %v837_v40 = vld [vmem:[#allocation2 + $0x14] sm:$0xf] }
  0x26   :  { %304 = vmatpush.bf16.msra.mxu1 %v782_v5  ;;  %v695_v41 = vld [vmem:[#allocation2 + $0x18] sm:$0xf0]  ;;  %v694_v42 = vor.u32 %v838_v39, %v693_v38  ;;  %v1025_v50 = vmov 32.0   ;;  %s665_s8 = sshll.u32 %s1233_s4, 4  ;;  %s1027_s9 = smov 256   ;;  %s666_s8 = int_to_ptr.hbm [resolvable:$true] %s665_s8 }
  0x27   :  { %323 = vmatpush.bf16.msra.mxu2 %v722_v6  ;;  %v698_v43 = vor.u32 %v837_v40, %v695_v41  ;;  %880 = vrcp.f32 %v1025_v50  ;;  %s1028_s10 = smov 16  }
  0x28   :  { %342 = vmatpush.bf16.msra.mxu3 %v786_v10 }
  0x29   :  { %286 = vmatpush.bf16.msra.mxu0 %v710_v16 }
  0x2a   :  { %305 = vmatpush.bf16.msra.mxu1 %v774_v17 }
  0x2b   :  { %324 = vmatpush.bf16.msra.mxu2 %v714_v18 }
  0x2c   :  { %343 = vmatpush.bf16.msra.mxu3 %v778_v22 }
  0x2d   :  { %287 = vmatpush.bf16.msra.mxu0 %v702_v28  ;;  %v881_v55 = vpop.eup %880 }
  0x2e   :  { %306 = vmatpush.bf16.msra.mxu1 %v766_v31  ;;  %v375_v60 = vmul.f32 32.0, %v881_v55  ;;  %vm379_vm0 = vweird.f32 %v881_v55 }
  0x2f   :  { %325 = vmatpush.bf16.msra.mxu2 %v706_v32 }
  0x30   :  { %344 = vmatpush.bf16.msra.mxu3 %v770_v35  ;;  %288 = vmatmul.bf16.vlgmr.msra.gmra.mxu0 %v686_v36  ;;  %v376_v4 = vsub.f32 1.0, %v375_v60 }
  0x31   :  { %307 = vmatmul.bf16.vlgmr.msra.gmra.mxu1 %v690_v37 }
  0x32   :  { %326 = vmatmul.bf16.vlgmr.msra.gmra.mxu2 %v686_v36  ;;  %v377_v10 = vmul.f32 %v881_v55, %v376_v4 }
  0x33   :  { %345 = vmatmul.bf16.vlgmr.msra.gmra.mxu3 %v690_v37 }
  0x34   :  { %v378_v17 = vadd.f32 %v881_v55, %v377_v10 }
  0x36   :  { %v380_v22 = vsel %vm379_vm0, %v881_v55, %v378_v17  ;;  %v463_v17 = vld [vmem:[%s1232_s3] sm:$0x3]  ;;  %s1026_s3 = smov [#allocation8]  }
  0x37   :  { %s663_s5 = sshll.u32 %s1026_s3, 4  ;;  %s664_s5 = int_to_ptr.vmem [resolvable:$true] %s663_s5 }
  0x40   :  { %293 = vmatmul.bf16.gmra.mxu0 %v694_v42 }
  0x41   :  { %312 = vmatmul.bf16.gmra.mxu1 %v698_v43 }
  0x42   :  { %331 = vmatmul.bf16.gmra.mxu2 %v694_v42 }
  0x43   :  { %350 = vmatmul.bf16.gmra.mxu3 %v698_v43 }
  0xad   :  { %v289_v44 = vpop.f32.mrf.mxu0 }
  0xae   :  { %v308_v45 = vpop.f32.mrf.mxu1 }
  0xaf   :  { %v309_v57 = vadd.f32 %v308_v45, %v289_v44 }
  0xb5   :  { %v327_v46 = vpop.f32.mrf.mxu2  ;;  %v291_v48 = vpop.f32.mrf.mxu0 }
  0xb6   :  { %v346_v47 = vpop.f32.mrf.mxu3  ;;  %v310_v49 = vpop.f32.mrf.mxu1 }
  0xb7   :  { %v311_v56 = vadd.f32 %v310_v49, %v291_v48  ;;  %v347_v6 = vadd.f32 %v346_v47, %v327_v46 }
  0xb9   :  { %v356_v61 = vadd.f32 %v311_v56, %v309_v57 }
  0xbd   :  { %v329_v51 = vpop.f32.mrf.mxu2  ;;  %v294_v53 = vpop.f32.mrf.mxu0 }
  0xbe   :  { %v348_v52 = vpop.f32.mrf.mxu3  ;;  %v313_v54 = vpop.f32.mrf.mxu1 }
  0xbf   :  { %v314_v58 = vadd.f32 %v313_v54, %v294_v53  ;;  %v349_v3 = vadd.f32 %v348_v52, %v329_v51 }
  0xc1   :  { %v357_v1 = vadd.f32 %v356_v61, %v314_v58  ;;  %v365_v9 = vadd.f32 %v349_v3, %v347_v6 }
  0xc5   :  { %v332_v59 = vpop.f32.mrf.mxu2  ;;  %v296_v63 = vpop.f32.mrf.mxu0 }
  0xc6   :  { %v351_v62 = vpop.f32.mrf.mxu3  ;;  %v315_v0 = vpop.f32.mrf.mxu1 }
  0xc7   :  { %v316_v2 = vadd.f32 %v315_v0, %v296_v63  ;;  %v352_v7 = vadd.f32 %v351_v62, %v332_v59 }
  0xc9   :  { %v358_v5 = vadd.f32 %v357_v1, %v316_v2  ;;  %v366_v14 = vadd.f32 %v365_v9, %v352_v7  ;;  %v444_v9 = vld [vmem:[#allocation7] sm:$0x3] }
  0xcb   :  { %v359_v8 = vrot.slane %v358_v5, 4 }
  0xcd   :  { %v334_v11 = vpop.f32.mrf.mxu2  ;;  %v360_v12 = vadd.f32 %v359_v8, %v358_v5 }
  0xce   :  { %v353_v13 = vpop.f32.mrf.mxu3 }
  0xcf   :  { %v354_v15 = vadd.f32 %v353_v13, %v334_v11  ;;  %v361_v16 = vrot.slane %v360_v12, 2 }
  0xd1   :  { %v367_v18 = vadd.f32 %v366_v14, %v354_v15  ;;  %v362_v19 = vadd.f32 %v361_v16, %v360_v12  ;;  %v446_v12 = vperm.slane %v444_v9, 0 }
  0xd3   :  { %v368_v20 = vrot.slane %v367_v18, 4  ;;  %v363_v21 = vrot.slane %v362_v19, 1 }
  0xd5   :  { %v369_v23 = vadd.f32 %v368_v20, %v367_v18  ;;  %v364_v24 = vadd.f32 %v363_v21, %v362_v19  ;;  %v465_v21 = vperm.slane %v463_v17, 0 }
  0xd7   :  { %v370_v25 = vrot.slane %v369_v23, 2  ;;  %v381_v26 = vmul.f32 %v380_v22, %v364_v24 }
  0xd9   :  { %v371_v27 = vadd.f32 %v370_v25, %v369_v23  ;;  %v1063_v28 = vsub.f32 %v309_v57, %v381_v26  ;;  %v1065_v29 = vsub.f32 %v311_v56, %v381_v26  ;;  %v1067_v30 = vsub.f32 %v314_v58, %v381_v26 }
  0xda   :  { %v1069_v32 = vsub.f32 %v316_v2, %v381_v26 }
  0xdb   :  { %v372_v31 = vrot.slane %v371_v27, 1  ;;  %v391_v33 = vmul.f32 %v1063_v28, %v1063_v28  ;;  %v393_v34 = vmul.f32 %v1065_v29, %v1065_v29  ;;  %v395_v36 = vmul.f32 %v1067_v30, %v1067_v30 }
  0xdc   :  { %v397_v39 = vmul.f32 %v1069_v32, %v1069_v32 }
  0xdd   :  { %v373_v35 = vadd.f32 %v372_v31, %v371_v27  ;;  %v399_v37 = vadd.f32 %v393_v34, %v391_v33  ;;  %v447_v31 = vperm.slane %v444_v9, 1 }
  0xdf   :  { %v382_v38 = vmul.f32 %v380_v22, %v373_v35  ;;  %v400_v40 = vadd.f32 %v399_v37, %v395_v36 }
  0xe1   :  { %v1079_v41 = vsub.f32 %v347_v6, %v382_v38  ;;  %v1081_v42 = vsub.f32 %v349_v3, %v382_v38  ;;  %v1083_v43 = vsub.f32 %v352_v7, %v382_v38  ;;  %v401_v44 = vadd.f32 %v400_v40, %v397_v39 }
  0xe2   :  { %v1085_v45 = vsub.f32 %v354_v15, %v382_v38 }
  0xe3   :  { %v392_v46 = vmul.f32 %v1079_v41, %v1079_v41  ;;  %v394_v47 = vmul.f32 %v1081_v42, %v1081_v42  ;;  %v402_v48 = vrot.slane %v401_v44, 4  ;;  %v396_v49 = vmul.f32 %v1083_v43, %v1083_v43 }
  0xe4   :  { %v398_v52 = vmul.f32 %v1085_v45, %v1085_v45 }
  0xe5   :  { %v408_v50 = vadd.f32 %v394_v47, %v392_v46  ;;  %v403_v51 = vadd.f32 %v402_v48, %v401_v44 }
  0xe7   :  { %v409_v53 = vadd.f32 %v408_v50, %v396_v49  ;;  %v404_v54 = vrot.slane %v403_v51, 2 }
  0xe9   :  { %v410_v55 = vadd.f32 %v409_v53, %v398_v52  ;;  %v405_v56 = vadd.f32 %v404_v54, %v403_v51 }
  0xeb   :  { %v411_v57 = vrot.slane %v410_v55, 4  ;;  %v406_v58 = vrot.slane %v405_v56, 1 }
  0xed   :  { %v412_v59 = vadd.f32 %v411_v57, %v410_v55  ;;  %v407_v60 = vadd.f32 %v406_v58, %v405_v56 }
  0xef   :  { %v413_v61 = vrot.slane %v412_v59, 2  ;;  %v417_v62 = vmul.f32 %v407_v60, %v380_v22  ;;  %v1123_v60 = vld [vmem:[#allocation2 + $0x18] sm:$0xff] }
  0xf1   :  { %v414_v63 = vadd.f32 %v413_v61, %v412_v59  ;;  %v419_v0 = vadd.f32 1e-05, %v417_v62 }
  0xf3   :  { %v415_v1 = vrot.slane %v414_v63, 1  ;;  %882 = vrsqrt.f32 %v419_v0  ;;  %vm427_vm2 = vweird.f32 %v419_v0 }
  0xf5   :  { %v416_v2 = vadd.f32 %v415_v1, %v414_v63 }
  0xf7   :  { %v418_v3 = vmul.f32 %v416_v2, %v380_v22 }
  0xf9   :  { %v420_v4 = vadd.f32 1e-05, %v418_v3  ;;  %v883_v5 = vpop.eup %882 }
  0xfa   :  { %v422_v6 = vmul.f32 %v883_v5, %v419_v0  ;;  %vm428_vm1 = vweird.f32 %v883_v5 }
  0xfb   :  { %884 = vrsqrt.f32 %v420_v4  ;;  %vm429_vm3 = vmor %vm427_vm2, %vm428_vm1  ;;  %vm437_vm5 = vweird.f32 %v420_v4 }
  0xfc   :  { %v423_v7 = vmul.f32 %v883_v5, %v422_v6 }
  0xfe   :  { %v424_v8 = vmul.f32 0.5, %v423_v7 }
 0x100   :  { %v425_v11 = vsub.f32 1.5, %v424_v8 }
 0x101   :  { %v885_v10 = vpop.eup %884 }
 0x102   :  { %v432_v13 = vmul.f32 %v885_v10, %v420_v4  ;;  %v426_v14 = vmul.f32 %v883_v5, %v425_v11  ;;  %vm438_vm4 = vweird.f32 %v885_v10 }
 0x103   :  { %vm439_vm6 = vmor %vm437_vm5, %vm438_vm4 }
 0x104   :  { %v433_v15 = vmul.f32 %v885_v10, %v432_v13  ;;  %v430_v16 = vsel %vm429_vm3, %v883_v5, %v426_v14  ;;  %v641_v5 = vunpack.c.l.bf16 %v1123_v60 }
 0x105   :  { %v450_v18 = vmul.f32 %v446_v12, %v430_v16 }
 0x106   :  { %v434_v19 = vmul.f32 0.5, %v433_v15 }
 0x107   :  { %v452_v20 = vperm.slane %v450_v18, 0 }
 0x108   :  { %v435_v22 = vsub.f32 1.5, %v434_v19 }
 0x109   :  { %v454_v23 = vmul.f32 %v452_v20, %v1063_v28  ;;  %v456_v24 = vmul.f32 %v452_v20, %v1065_v29  ;;  %v458_v25 = vmul.f32 %v452_v20, %v1067_v30  ;;  %v460_v26 = vmul.f32 %v452_v20, %v1069_v32 }
 0x10a   :  { %v436_v27 = vmul.f32 %v885_v10, %v435_v22  ;;  %v466_v32 = vperm.slane %v463_v17, 1 }
 0x10b   :  { %v469_v33 = vadd.f32 %v465_v21, %v454_v23  ;;  %v471_v34 = vadd.f32 %v465_v21, %v456_v24  ;;  %v473_v35 = vadd.f32 %v465_v21, %v458_v25  ;;  %v475_v36 = vadd.f32 %v465_v21, %v460_v26 }
 0x10c   :  { %v440_v37 = vsel %vm439_vm6, %v885_v10, %v436_v27 }
 0x10d   :  { %v827_v38 = vmul.f32 -1.442695, %v469_v33  ;;  %v829_v39 = vmul.f32 -1.442695, %v471_v34  ;;  %v831_v40 = vmul.f32 -1.442695, %v473_v35  ;;  %v451_v28 = vmul.f32 %v447_v31, %v440_v37 }
 0x10e   :  { %v833_v44 = vmul.f32 -1.442695, %v475_v36 }
 0x10f   :  { %886 = vpow2.f32 %v827_v38  ;;  %v453_v29 = vperm.slane %v451_v28, 0 }
 0x110   :  { %888 = vpow2.f32 %v829_v39 }
 0x111   :  { %890 = vpow2.f32 %v831_v40  ;;  %v455_v30 = vmul.f32 %v453_v29, %v1079_v41  ;;  %v457_v46 = vmul.f32 %v453_v29, %v1081_v42  ;;  %v459_v48 = vmul.f32 %v453_v29, %v1083_v43  ;;  %v1113_v41 = vld [vmem:[#allocation2] sm:$0xff]  ;;  %v1118_v43 = vld [vmem:[#allocation2 + $0x8] sm:$0xff] }
 0x112   :  { %892 = vpow2.f32 %v833_v44  ;;  %v461_v49 = vmul.f32 %v453_v29, %v1085_v45  ;;  %v1120_v45 = vld [vmem:[#allocation2 + $0x10] sm:$0xff]  ;;  %v635_v0 = vunpack.c.l.bf16 %v1113_v41  ;;  %v637_v1 = vunpack.c.l.bf16 %v1118_v43 }
 0x113   :  { %v470_v52 = vadd.f32 %v466_v32, %v455_v30  ;;  %v472_v42 = vadd.f32 %v466_v32, %v457_v46  ;;  %v474_v58 = vadd.f32 %v466_v32, %v459_v48  ;;  %v639_v2 = vunpack.c.l.bf16 %v1120_v45 }
 0x114   :  { %v476_v59 = vadd.f32 %v466_v32, %v461_v49  ;;  %v640_v12 = vunpack.c.h.bf16 %v1120_v45 }
 0x115   :  { %v887_v47 = vpop.eup %886  ;;  %v828_v61 = vmul.f32 -1.442695, %v470_v52  ;;  %v830_v3 = vmul.f32 -1.442695, %v472_v42  ;;  %v832_v6 = vmul.f32 -1.442695, %v474_v58 }
 0x116   :  { %v889_v50 = vpop.eup %888  ;;  %v1106_v51 = vadd.f32 1.0, %v887_v47  ;;  %v834_v7 = vmul.f32 -1.442695, %v476_v59 }
 0x117   :  { %v891_v53 = vpop.eup %890  ;;  %v1108_v54 = vadd.f32 1.0, %v889_v50 }
 0x118   :  { %v893_v55 = vpop.eup %892  ;;  %v1110_v56 = vadd.f32 1.0, %v891_v53  ;;  %894 = vrcp.f32 %v1106_v51  ;;  %v518_v62 = vand.u32 2147483647, %v1106_v51  ;;  %v520_v63 = vand.u32 2147483648, %v1106_v51 }
 0x119   :  { %v1115_v57 = vadd.f32 1.0, %v893_v55  ;;  %896 = vrcp.f32 %v1108_v54  ;;  %v548_v4 = vand.u32 2147483647, %v1108_v54  ;;  %vm514_vm7 = vweird.f32 %v1106_v51 }
 0x11a   :  { %898 = vrcp.f32 %v1110_v56  ;;  %vm544_vm8 = vweird.f32 %v1108_v54  ;;  %v550_v9 = vand.u32 2147483648, %v1108_v54  ;;  %vm1137_vm9 = vcmp.eq.f32.partialorder %v518_v62, 8.507059e+37 }
 0x11b   :  { %900 = vrcp.f32 %v1115_v57  ;;  %v521_v13 = vor.u32 1.1754944e-38, %v520_v63  ;;  %vm574_vm10 = vweird.f32 %v1110_v56  ;;  %v578_v16 = vand.u32 2147483647, %v1110_v56 }
 0x11c   :  { %902 = vpow2.f32 %v828_v61  ;;  %v580_v17 = vand.u32 2147483648, %v1110_v56  ;;  %vm1145_vm11 = vcmp.eq.f32.partialorder %v548_v4, 8.507059e+37  ;;  %v551_v23 = vor.u32 1.1754944e-38, %v550_v9 }
 0x11d   :  { %904 = vpow2.f32 %v830_v3  ;;  %vm604_vm13 = vweird.f32 %v1115_v57  ;;  %vm1152_vm0 = vcmp.eq.f32.partialorder %v578_v16, 8.507059e+37  ;;  %v608_v44 = vand.u32 2147483647, %v1115_v57 }
 0x11e   :  { %v895_v8 = vpop.eup %894  ;;  %906 = vpow2.f32 %v832_v6  ;;  %v581_v40 = vor.u32 1.1754944e-38, %v580_v17  ;;  %v610_v28 = vand.u32 2147483648, %v1115_v57  ;;  %v636_v9 = vunpack.c.h.bf16 %v1113_v41 }
 0x11f   :  { %v897_v10 = vpop.eup %896  ;;  %v510_v11 = vmul.f32 %v895_v8, %v1106_v51  ;;  %vm515_vm12 = vweird.f32 %v895_v8  ;;  %908 = vpow2.f32 %v834_v7  ;;  %vm609_vm6 = vcmp.eq.f32.partialorder %v608_v44, 8.507059e+37 }
 0x120   :  { %v899_v14 = vpop.eup %898  ;;  %v540_v15 = vmul.f32 %v897_v10, %v1108_v54  ;;  %vm545_vm14 = vweird.f32 %v897_v10  ;;  %vm516_vm1 = vmor %vm514_vm7, %vm515_vm12 }
 0x121   :  { %v511_v18 = vsub.f32 1.0, %v510_v11  ;;  %v570_v20 = vmul.f32 %v899_v14, %v1110_v56  ;;  %v901_v21 = vpop.eup %900  ;;  %vm575_vm15 = vweird.f32 %v899_v14  ;;  %vm546_vm2 = vmor %vm544_vm8, %vm545_vm14  ;;  %v611_v56 = vor.u32 1.1754944e-38, %v610_v28 }
 0x122   :  { %v541_v22 = vsub.f32 1.0, %v540_v15  ;;  %v600_v26 = vmul.f32 %v901_v21, %v1115_v57  ;;  %v903_v27 = vpop.eup %902  ;;  %vm605_vm3 = vweird.f32 %v901_v21  ;;  %vm576_vm4 = vmor %vm574_vm10, %vm575_vm15  ;;  %v638_v11 = vunpack.c.h.bf16 %v1118_v43 }
 0x123   :  { %v512_v24 = vmul.f32 %v895_v8, %v511_v18  ;;  %v571_v25 = vsub.f32 1.0, %v570_v20  ;;  %v1156_v37 = vadd.f32 1.0, %v903_v27  ;;  %v905_v38 = vpop.eup %904  ;;  %vm606_vm5 = vmor %vm604_vm13, %vm605_vm3 }
 0x124   :  { %v542_v31 = vmul.f32 %v897_v10, %v541_v22  ;;  %v601_v36 = vsub.f32 1.0, %v600_v26  ;;  %v907_v29 = vpop.eup %906  ;;  %v1171_v49 = vadd.f32 1.0, %v905_v38 }
 0x125   :  { %v513_v34 = vadd.f32 %v895_v8, %v512_v24  ;;  %v572_v35 = vmul.f32 %v899_v14, %v571_v25  ;;  %910 = vrcp.f32 %v1156_v37  ;;  %v909_v50 = vpop.eup %908  ;;  %v1184_v58 = vadd.f32 1.0, %v907_v29 }
 0x126   :  { %v543_v39 = vadd.f32 %v897_v10, %v542_v31  ;;  %v602_v46 = vmul.f32 %v901_v21, %v601_v36  ;;  %v1188_v63 = vadd.f32 1.0, %v909_v50  ;;  %912 = vrcp.f32 %v1171_v49 }
 0x127   :  { %v517_v30 = vsel %vm516_vm1, %v895_v8, %v513_v34  ;;  %v573_v32 = vadd.f32 %v899_v14, %v572_v35  ;;  %914 = vrcp.f32 %v1184_v58  ;;  %v533_v3 = vand.u32 2147483647, %v1156_v37 }
 0x128   :  { %v522_v47 = vsel %vm1137_vm9, %v521_v13, %v517_v30  ;;  %v547_v48 = vsel %vm546_vm2, %v897_v10, %v543_v39  ;;  %v603_v53 = vadd.f32 %v901_v21, %v602_v46  ;;  %916 = vrcp.f32 %v1188_v63 }
 0x129   :  { %v552_v51 = vsel %vm1145_vm11, %v551_v23, %v547_v48  ;;  %v577_v52 = vsel %vm576_vm4, %v899_v14, %v573_v32  ;;  %v643_v54 = vmul.f32 %v635_v0, %v522_v47  ;;  %v535_v6 = vand.u32 2147483648, %v1156_v37 }
 0x12a   :  { %v582_v55 = vsel %vm1152_vm0, %v581_v40, %v577_v52  ;;  %v645_v42 = vmul.f32 %v637_v1, %v552_v51  ;;  %v607_v59 = vsel %vm606_vm5, %v901_v21, %v603_v53  ;;  %v563_v7 = vand.u32 2147483647, %v1171_v49 }
 0x12b   :  { %v647_v61 = vmul.f32 %v639_v2, %v582_v55  ;;  %651 = vst [vmem:[#allocation8] sm:$0xff] %v643_v54  ;;  %v612_v62 = vsel %vm609_vm6, %v611_v56, %v607_v59  ;;  %v911_v0 = vpop.eup %910  ;;  %vm529_vm8 = vweird.f32 %v1156_v37  ;;  %vm559_vm9 = vweird.f32 %v1171_v49 }
 0x12c   :  { %653 = vst [vmem:[#allocation8 + $0x10] sm:$0xff] %v645_v42  ;;  %v649_v57 = vmul.f32 %v641_v5, %v612_v62  ;;  %v525_v1 = vmul.f32 %v911_v0, %v1156_v37  ;;  %v913_v4 = vpop.eup %912  ;;  %vm530_vm7 = vweird.f32 %v911_v0  ;;  %vm534_vm10 = vcmp.eq.f32.partialorder %v533_v3, 8.507059e+37 }
 0x12d   :  { %655 = vst [vmem:[#allocation8 + $0x20] sm:$0xff] %v647_v61  ;;  %v555_v5 = vmul.f32 %v913_v4, %v1171_v49  ;;  %v915_v10 = vpop.eup %914  ;;  %vm531_vm11 = vmor %vm529_vm8, %vm530_vm7  ;;  %v536_v17 = vor.u32 1.1754944e-38, %v535_v6  ;;  %vm560_vm12 = vweird.f32 %v913_v4  ;;  %vm1206_vm13 = vcmp.eq.f32.partialorder %v563_v7, 8.507059e+37 }
 0x12e   :  { %657 = vst [vmem:[#allocation8 + $0x30] sm:$0xff] %v649_v57  ;;  %v526_v2 = vsub.f32 1.0, %v525_v1  ;;  %v585_v15 = vmul.f32 %v915_v10, %v1184_v58  ;;  %v917_v16 = vpop.eup %916  ;;  %v565_v18 = vand.u32 2147483648, %v1171_v49  ;;  %vm590_vm14 = vweird.f32 %v915_v10  ;;  %vm561_vm15 = vmor %vm559_vm9, %vm560_vm12 }
 0x12f   :  { %v556_v14 = vsub.f32 1.0, %v555_v5  ;;  %v615_v45 = vmul.f32 %v917_v16, %v1188_v63  ;;  %v593_v22 = vand.u32 2147483647, %v1184_v58  ;;  %v595_v23 = vand.u32 2147483648, %v1184_v58 }
 0x130   :  { %v527_v8 = vmul.f32 %v911_v0, %v526_v2  ;;  %v586_v43 = vsub.f32 1.0, %v585_v15  ;;  %v566_v31 = vor.u32 1.1754944e-38, %v565_v18  ;;  %vm589_vm0 = vweird.f32 %v1184_v58 }
 0x131   :  { %v557_v20 = vmul.f32 %v913_v4, %v556_v14  ;;  %v616_v26 = vsub.f32 1.0, %v615_v45  ;;  %v623_v33 = vand.u32 2147483647, %v1188_v63  ;;  %v625_v34 = vand.u32 2147483648, %v1188_v63  ;;  %vm591_vm2 = vmor %vm589_vm0, %vm590_vm14 }
 0x132   :  { %v528_v13 = vadd.f32 %v911_v0, %v527_v8  ;;  %v587_v25 = vmul.f32 %v915_v10, %v586_v43  ;;  %vm620_vm1 = vweird.f32 %v917_v16  ;;  %vm594_vm3 = vcmp.eq.f32.partialorder %v593_v22, 8.507059e+37 }
 0x133   :  { %v558_v24 = vadd.f32 %v913_v4, %v557_v20  ;;  %v617_v37 = vmul.f32 %v917_v16, %v616_v26  ;;  %v596_v39 = vor.u32 1.1754944e-38, %v595_v23  ;;  %v642_v40 = vunpack.c.h.bf16 %v1123_v60 }
 0x134   :  { %v532_v19 = vsel %vm531_vm11, %v911_v0, %v528_v13  ;;  %v588_v36 = vadd.f32 %v915_v10, %v587_v25  ;;  %vm619_vm4 = vweird.f32 %v1188_v63  ;;  %v626_v32 = vor.u32 1.1754944e-38, %v625_v34 }
 0x135   :  { %v537_v21 = vsel %vm534_vm10, %v536_v17, %v532_v19  ;;  %v562_v35 = vsel %vm561_vm15, %v913_v4, %v558_v24  ;;  %v618_v28 = vadd.f32 %v917_v16, %v617_v37  ;;  %vm621_vm5 = vmor %vm619_vm4, %vm620_vm1  ;;  %vm624_vm6 = vcmp.eq.f32.partialorder %v623_v33, 8.507059e+37 }
 0x136   :  { %v644_v27 = vmul.f32 %v636_v9, %v537_v21  ;;  %v567_v38 = vsel %vm1206_vm13, %v566_v31, %v562_v35  ;;  %v592_v44 = vsel %vm591_vm2, %v915_v10, %v588_v36 }
 0x137   :  { %v646_v29 = vmul.f32 %v638_v11, %v567_v38  ;;  %v597_v30 = vsel %vm594_vm3, %v596_v39, %v592_v44  ;;  %v622_v46 = vsel %vm621_vm5, %v917_v16, %v618_v28 }
 0x138   :  { %652 = vst [vmem:[#allocation8 + $0x8] sm:$0xff] %v644_v27  ;;  %v648_v47 = vmul.f32 %v640_v12, %v597_v30  ;;  %v627_v60 = vsel %vm624_vm6, %v626_v32, %v622_v46 }
 0x139   :  { %654 = vst [vmem:[#allocation8 + $0x18] sm:$0xff] %v646_v29  ;;  %v650_v48 = vmul.f32 %v642_v40, %v627_v60 }
 0x13a   :  { %656 = vst [vmem:[#allocation8 + $0x28] sm:$0xff] %v648_v47 }
 0x13b   :  { %658 = vst [vmem:[#allocation8 + $0x38] sm:$0xff] %v650_v48 }
 0x13c   :  { %671 = dma.vmem_to_hbm [thread:$0]  %s664_s5, 1024, %s666_s8, [#allocation4], %s1027_s9, %s1027_s9, %s1028_s10  }
 0x13d   :  { %1018 = dma.done.wait [#allocation4], 1024  }
 0x13e   :  { %1019 = vsyncadd [#allocation4], 4294966272 }
 0x13f   :  { %676 = vsyncpa [#allocation3], 1 }
 0x140   :  { %677 = vsyncpa [#allocation6], 1 }
 0x141   :  { %678 = vsyncpa [#allocation4], 1 }

</bundles_post_ra>
